<compile_context>
chip_gen: v7x
topology: tpu7x:2x2x1
jax: 0.10.0
libtpu: 0.0.40
codegen_flags: <defaults>
</compile_context>

<pallas_src>
import functools

import jax
import jax.numpy as jnp
import numpy as np
from jax import lax
from jax.experimental import pallas as pl
from jax.experimental.pallas import tpu as pltpu


def _round_up(x, m):
    return ((x + m - 1) // m) * m


def _embedder_kernel(cidx_ref, bd_ref, bias_ref, out_ref, *, row_chunk, n_chunks):
    """One grid step: R = n_chunks * row_chunk output rows of P packed tokens each.

    cidx_ref: (R, P)         int32    raw element indices, P tokens packed per row
    bd_ref:   (P*Vp, P*Dp)   bf16/f32 block-diagonal fused (table @ W^T), zero padded
    bias_ref: (1, P*Dp)      f32      Linear bias tiled P times along lanes
    out_ref:  (R, P*Dp)      f32      lane-dense output slab (one row = P tokens)
    """
    p_pack = cidx_ref.shape[1]
    vp = bd_ref.shape[0] // p_pack
    pd = out_ref.shape[1]

    bd = bd_ref[...]
    # Hoisted out of the sub-block loop (JAX does not CSE broadcasts).
    bias = jnp.broadcast_to(bias_ref[...], (row_chunk, pd))
    iota = lax.broadcasted_iota(jnp.int32, (row_chunk, vp), 1)

    # Fully-unrolled sub-block loop (== lax.fori_loop(..., unroll=True) with static
    # offsets).  Each sub-block's live set fits comfortably in the 64-vreg file.
    for c in range(n_chunks):
        r0 = c * row_chunk                                  # static offset
        cidx = cidx_ref[pl.ds(r0, row_chunk), :]            # (row_chunk, P)
        # Per-slot one-hot: each 128-wide lane group is compared only against its
        # own slot's index and cast directly to the MXU dtype (no OR chain).
        blocks = [(iota == cidx[:, p:p + 1]).astype(bd.dtype) for p in range(p_pack)]
        onehot = blocks[0] if p_pack == 1 else jnp.concatenate(blocks, axis=1)
        # Single MXU matmul per sub-block, f32 accumulation.
        acc = jnp.dot(onehot, bd, preferred_element_type=jnp.float32)
        out_ref[pl.ds(r0, row_chunk), :] = (acc + bias).astype(out_ref.dtype)


def make_embedder_params(table, w, b, *, mxu_dtype=jnp.bfloat16):
    """Precompute fused/packed weights once (hoisted out of the forward path).

    table: (V, F) f32  embedding table (row 0 = zero padding row, as in CrabNet)
    w:     (D, F) f32  nn.Linear weight (PyTorch layout)
    b:     (D,)   f32  nn.Linear bias
    """
    V, F = table.shape
    D = w.shape[0]

    # Lane-dense output packing: P tokens per (multiple of) 128-lane stored row.
    if D <= 128 and 128 % D == 0:
        P, Dp = 128 // D, D
    else:
        P, Dp = 1, _round_up(D, 128)       # pad feature dim; wrapper slices it off

    Vp = _round_up(V, 128)                 # pad contraction depth with zero rows

    table_pad = jnp.pad(table.astype(jnp.float32), ((0, Vp - V), (0, 0)))
    fused = jnp.dot(table_pad, w.astype(jnp.float32).T)                    # (Vp, D)
    fused = jnp.pad(fused, ((0, 0), (0, Dp - D)))                          # (Vp, Dp)
    # Block-diagonal packing so P tokens share one MXU matmul / one stored row.
    bd = jnp.kron(jnp.eye(P, dtype=jnp.float32), fused).astype(mxu_dtype)  # (P*Vp, P*Dp)
    bias = jnp.pad(b.astype(jnp.float32), (0, Dp - D))
    bias_tiled = jnp.tile(bias.reshape(1, Dp), (1, P))                     # (1, P*Dp)

    return {"bd": bd, "bias": bias_tiled, "P": P, "Vp": Vp, "D": D, "Dp": Dp}


def embedder_forward(src, params, *, token_block=2048):
    """src: (B, T) int32 -> (B, T, D) f32  (== fc_mat2vec(cbfv(src)))."""
    B, T = src.shape
    N = B * T
    P, Vp, D, Dp = params["P"], params["Vp"], params["D"], params["Dp"]
    bd, bias = params["bd"], params["bias"]
    PD = P * Dp

    row_unit = 8 * P          # tokens per 8 output rows (sublane granularity)
    big_unit = 64 * P         # tokens per 64-row in-kernel sub-block

    Nr = _round_up(N, row_unit)
    if Nr <= big_unit:
        tb = Nr                                        # one small block, one sub-chunk
    else:
        tb = _round_up(min(token_block, Nr), big_unit)
        if tb >= Nr:                                   # keep >= 2 grid steps (v7x dual-TC)
            tb = max(big_unit, _round_up((Nr + 1) // 2, big_unit))
    grid = -(-Nr // tb)
    Np = grid * tb
    R = tb // P
    row_chunk = min(R, 64)
    n_chunks = R // row_chunk

    # Pad with index 0 (the all-zero padding row); pack P tokens per stored row.
    idx = src.reshape(-1).astype(jnp.int32)
    idx = jnp.pad(idx, (0, Np - N))
    cidx = idx.reshape(Np // P, P)

    # Explicit VMEM budget (v5e scoped default is only 16 MiB); real need is about
    # 2x one block (double buffering) -- 4x + 8 MiB floor leaves headroom.
    itemsize = jnp.dtype(bd.dtype).itemsize
    block_bytes = R * P * 4 + bd.size * itemsize + PD * 4 + R * PD * 4
    vmem_limit = int(min(64 * 2**20, max(8 * 2**20, 4 * block_bytes)))

    kernel = functools.partial(_embedder_kernel, row_chunk=row_chunk, n_chunks=n_chunks)

    out_slab = pl.pallas_call(
        kernel,
        out_shape=jax.ShapeDtypeStruct((Np // P, PD), jnp.float32),
        grid_spec=pltpu.PrefetchScalarGridSpec(
            num_scalar_prefetch=0,
            grid=(grid,),
            in_specs=[
                pl.BlockSpec((R, P), lambda i: (i, 0)),        # packed token indices
                pl.BlockSpec(bd.shape, lambda i: (0, 0)),      # fused block-diag (resident)
                pl.BlockSpec((1, PD), lambda i: (0, 0)),       # tiled bias (resident)
            ],
            out_specs=pl.BlockSpec((R, PD), lambda i: (i, 0)),
        ),
        compiler_params=pltpu.CompilerParams(
            dimension_semantics=("parallel",),
            vmem_limit_bytes=vmem_limit,
        ),
    )(cidx, bd, bias)

    # (Np/P, P*Dp) row-major is byte-identical to (Np, Dp); drop token/feature pad.
    return out_slab.reshape(Np, Dp)[:N, :D].reshape(B, T, D)


if __name__ == "__main__":
    key = jax.random.PRNGKey(0)
    k_tab, k_w, k_b, k_src = jax.random.split(key, 4)

    # Small shapes consistent with the module:
    #   num_elements = 31 (+1 zero padding row), feat_size = 64, d_model = 32
    num_elements = 31
    feat_size = 64
    d_model = 32
    B, T = 2, 8

    # TODO(synk): the real module loads mat2vec.csv element features from disk; a
    # synthetic deterministic table (row 0 = zeros padding row) is used instead.
    cbfv = jax.random.normal(k_tab, (num_elements, feat_size), dtype=jnp.float32)
    table = jnp.concatenate(
        [jnp.zeros((1, feat_size), dtype=jnp.float32), cbfv], axis=0
    )  # (V, F) with V = 32

    # nn.Linear(feat_size, d_model): weight (d_model, feat_size), bias (d_model,)
    w = jax.random.normal(k_w, (d_model, feat_size), dtype=jnp.float32) * 0.05
    b = jax.random.normal(k_b, (d_model,), dtype=jnp.float32) * 0.05

    # Token indices in [0, num_elements] (0 = padding row).
    src = jax.random.randint(k_src, (B, T), 0, num_elements + 1, dtype=jnp.int32)

    params = make_embedder_params(table, w, b)           # default: bf16 MXU operands
    out = jax.block_until_ready(embedder_forward(src, params))

    # References.
    ref_f32 = table[src] @ w.T + b                       # PyTorch f32 semantics
    # The bf16-weight kernel is exact w.r.t. the bf16-rounded fused weights it
    # actually uses (one-hot selection + f32 accumulation introduce no extra error).
    Vp, D = params["Vp"], params["D"]
    fused_bf = params["bd"][:Vp, :D].astype(jnp.float32)  # slot-0 block of fused matrix
    ref_exact = fused_bf[src] + b

    assert out.shape == (B, T, d_model)
    assert np.allclose(np.asarray(out), np.asarray(ref_exact), atol=1e-5, rtol=1e-5)
    # vs. pure f32 reference the only difference is bf16 rounding of the fused
    # weights (<~1% relative) -- tolerance loosened accordingly for this check.
    assert np.allclose(np.asarray(out), np.asarray(ref_f32), atol=5e-2, rtol=5e-2)
    print("KERNEL_OK")
</pallas_src>

<mosaic_0001>
module attributes {stable_mosaic.version = 11 : i64} {
  func.func @_embedder_kernel(%arg0: i32, %arg1: memref<8x4xi32, #tpu.memory_space<vmem>>, %arg2: memref<512x128xbf16, #tpu.memory_space<vmem>>, %arg3: memref<1x128xf32, #tpu.memory_space<vmem>>, %arg4: memref<8x128xf32, #tpu.memory_space<vmem>>) attributes {dimension_semantics = [#tpu.dimension_semantics<parallel>], iteration_bounds = array<i64: 1>, scalar_prefetch = 0 : i64, scratch_operands = 0 : i64, tpu.core_type = #tpu.core_type<tc>, window_params = [{transform_indices = @transform_0, window_bounds = array<i64: 8, 4>}, {pipeline_mode = #tpu.pipeline_mode<synchronous>, transform_indices = @transform_1, window_bounds = array<i64: 512, 128>}, {pipeline_mode = #tpu.pipeline_mode<synchronous>, transform_indices = @transform_2, window_bounds = array<i64: 1, 128>}, {transform_indices = @transform_3, window_bounds = array<i64: 8, 128>}]} {
    %c0 = arith.constant 0 : index
    %c0_0 = arith.constant 0 : index
    %0 = vector.load %arg2[%c0, %c0_0] : memref<512x128xbf16, #tpu.memory_space<vmem>>, vector<512x128xbf16>
    %c0_1 = arith.constant 0 : index
    %c0_2 = arith.constant 0 : index
    %1 = vector.load %arg3[%c0_1, %c0_2] : memref<1x128xf32, #tpu.memory_space<vmem>>, vector<1x128xf32>
    %2 = vector.shape_cast %1 : vector<1x128xf32> to vector<1x128xf32>
    %3 = vector.broadcast %2 : vector<1x128xf32> to vector<8x128xf32>
    %4 = tpu.iota {dimensions = array<i32: 1>} : vector<8x128xi32>
    %c0_3 = arith.constant 0 : index
    %c0_4 = arith.constant 0 : index
    %5 = vector.load %arg1[%c0_3, %c0_4] : memref<8x4xi32, #tpu.memory_space<vmem>>, vector<8x4xi32>
    %6 = vector.extract_strided_slice %5 {offsets = [0, 0], sizes = [8, 1], strides = [1, 1]} : vector<8x4xi32> to vector<8x1xi32>
    %7 = vector.broadcast %6 : vector<8x1xi32> to vector<8x128xi32>
    %8 = arith.cmpi eq, %4, %7 : vector<8x128xi32>
    %9 = arith.extui %8 : vector<8x128xi1> to vector<8x128xi32>
    %10 = arith.sitofp %9 : vector<8x128xi32> to vector<8x128xf32>
    %11 = arith.truncf %10 : vector<8x128xf32> to vector<8x128xbf16>
    %12 = vector.extract_strided_slice %5 {offsets = [0, 1], sizes = [8, 1], strides = [1, 1]} : vector<8x4xi32> to vector<8x1xi32>
    %13 = vector.broadcast %12 : vector<8x1xi32> to vector<8x128xi32>
    %14 = arith.cmpi eq, %4, %13 : vector<8x128xi32>
    %15 = arith.extui %14 : vector<8x128xi1> to vector<8x128xi32>
    %16 = arith.sitofp %15 : vector<8x128xi32> to vector<8x128xf32>
    %17 = arith.truncf %16 : vector<8x128xf32> to vector<8x128xbf16>
    %18 = vector.extract_strided_slice %5 {offsets = [0, 2], sizes = [8, 1], strides = [1, 1]} : vector<8x4xi32> to vector<8x1xi32>
    %19 = vector.broadcast %18 : vector<8x1xi32> to vector<8x128xi32>
    %20 = arith.cmpi eq, %4, %19 : vector<8x128xi32>
    %21 = arith.extui %20 : vector<8x128xi1> to vector<8x128xi32>
    %22 = arith.sitofp %21 : vector<8x128xi32> to vector<8x128xf32>
    %23 = arith.truncf %22 : vector<8x128xf32> to vector<8x128xbf16>
    %24 = vector.extract_strided_slice %5 {offsets = [0, 3], sizes = [8, 1], strides = [1, 1]} : vector<8x4xi32> to vector<8x1xi32>
    %25 = vector.broadcast %24 : vector<8x1xi32> to vector<8x128xi32>
    %26 = arith.cmpi eq, %4, %25 : vector<8x128xi32>
    %27 = arith.extui %26 : vector<8x128xi1> to vector<8x128xi32>
    %28 = arith.sitofp %27 : vector<8x128xi32> to vector<8x128xf32>
    %29 = arith.truncf %28 : vector<8x128xf32> to vector<8x128xbf16>
    %30 = tpu.concatenate %11, %17, %23, %29 in 1 : vector<8x128xbf16>, vector<8x128xbf16>, vector<8x128xbf16>, vector<8x128xbf16> -> vector<8x512xbf16>
    %cst = arith.constant dense<0.000000e+00> : vector<8x128xf32>
    %31 = tpu.matmul %30, %0, %cst {dimension_numbers = #tpu.dot_dimension_numbers<[1], [0], [0], [1], [0, 0, 1, 1], [], []>} : vector<8x512xbf16>, vector<512x128xbf16>, vector<8x128xf32> -> vector<8x128xf32>
    %32 = arith.addf %31, %3 : vector<8x128xf32>
    %c0_5 = arith.constant 0 : index
    %c0_6 = arith.constant 0 : index
    %33 = vector.load %arg4[%c0_5, %c0_6] : memref<8x128xf32, #tpu.memory_space<vmem>>, vector<8x128xf32>
    tpu.vector_store %arg4[%c0_5, %c0_6], %32 {strides = array<i32>} : memref<8x128xf32, #tpu.memory_space<vmem>>, vector<8x128xf32>,
    return
  }
  func.func @transform_0(%arg0: i32) -> (i32, i32) {
    %c0_i32 = arith.constant 0 : i32
    %c0_i32_0 = arith.constant 0 : i32
    return %arg0, %c0_i32 : i32, i32
  }
  func.func @transform_1(%arg0: i32) -> (i32, i32) {
    %c0_i32 = arith.constant 0 : i32
    %c0_i32_0 = arith.constant 0 : i32
    %c0_i32_1 = arith.constant 0 : i32
    return %c0_i32, %c0_i32_0 : i32, i32
  }
  func.func @transform_2(%arg0: i32) -> (i32, i32) {
    %c0_i32 = arith.constant 0 : i32
    %c0_i32_0 = arith.constant 0 : i32
    %c0_i32_1 = arith.constant 0 : i32
    return %c0_i32, %c0_i32_0 : i32, i32
  }
  func.func @transform_3(%arg0: i32) -> (i32, i32) {
    %c0_i32 = arith.constant 0 : i32
    %c0_i32_0 = arith.constant 0 : i32
    return %arg0, %c0_i32 : i32, i32
  }
}

</mosaic_0001>

<bundles_post_ra>
// kernel: tpu_custom_call.1
= control target key start
LH: loop header
LB: loop body
LE: loop exit
PB: predicated region body
PF: predicated region fallthrough
CT: control target
= control target key end

     0   :  { %8 = vsyncpa [#allocation3], 0  ;;  %s662_s0 = inlined_call_operand.vmem [shape: s32[8,4], index: 0, kind: input, shape index: {}]   ;;  %s663_s1 = inlined_call_operand.hbm [shape: bf16[512,128], index: 1, kind: input, shape index: {}]   ;;  %s664_s2 = inlined_call_operand.vmem [shape: f32[1,128], index: 2, kind: input, shape index: {}]   ;;  %s665_s3 = inlined_call_operand.hbm [shape: f32[8,128], index: 3, kind: output, shape index: {}]  }
   0x1   :  { %9 = vsyncpa [#allocation4], 0  ;;  %s603_s12 = smov [#allocation2]   ;;  %s555_s16 = scalar_lea.hbm %s663_s1, 4096 }
   0x2   :  { %s17_s13 = sshll.u32 %s603_s12, 4  ;;  %p556_p0 = scmp.ne.s32.totalorder %s663_s1, %s555_s16  ;;  %s18_s13 = int_to_ptr.vmem [resolvable:$true] %s17_s13 }
   0x3   :  { %p559_p1 = scmp.lt.u32.totalorder %s555_s16, %s663_s1 }
   0x5   :  { %p561_p2 = pnand %p559_p1, %p556_p0 }
   0x7   :  { %564 = shalt.err (!%p561_p2)
}
   0x8   :  { %s565_s21 = scalar_lea.vmem %s18_s13, 4096  ;;  %p570_p4 = scmp.lt.s32.totalorder %s18_s13, %s18_s13 }
   0x9   :  { %p566_p3 = scmp.ne.s32.totalorder %s18_s13, %s565_s21  ;;  %p571_p5 = scmp.lt.s32.totalorder %s565_s21, %s565_s21 }
   0xb   :  { %p572_p6 = por %p571_p5, %p570_p4 }
   0xd   :  { %p573_p7 = pnand %p572_p6, %p566_p3 }
   0xf   :  { %576 = shalt.err (!%p573_p7)
}
  0x10   :  { %s604_s22 = smov 64   ;;  %s605_s23 = smov 4  }
  0x11   :  { %23 = dma.hbm_to_vmem [thread:$0]  %s663_s1, 4096, %s18_s13, [#allocation3], %s604_s22, %s604_s22, %s605_s23  }
  0x12   :  { %599 = dma.done.wait [#allocation3], 4096  }
  0x13   :  { %600 = vsyncadd [#allocation3], 4294963200  ;;  %v606_v0 = vmov 3   ;;  %v607_v1 = vmov 1   ;;  %v103_v2 = vld [vmem:[%s662_s0] sm:$0xff]  ;;  %v523_v3 = vld [vmem:[#allocation2 + $0x40] sm:$0xff]   ;;  %v101_v37 = vlaneseq }
  0x14   :  { %520 = vset.pattern.permute.xlu1 %v606_v0  ;;  %518 = vset.pattern.permute.xlu0 %v607_v1  ;;  %v524_v4 = vld [vmem:[#allocation2 + $0xc0] sm:$0xff]   ;;  %v608_v7 = vmov 2   ;;  %v609_v8 = vmov 0   ;;  %v527_v9 = vld [vmem:[#allocation2 + $0x48] sm:$0xff]   ;;  %v531_v13 = vld [vmem:[#allocation2 + $0x50] sm:$0xff]   ;;  %s611_s28 = smov [#allocation5]  }
  0x15   :  { %126 = vperm.xlu1 %520, %v103_v2   ;;  %112 = vperm.xlu0 %518, %v103_v2   ;;  %v525_v5 = vld [vmem:[#allocation2] sm:$0xff]   ;;  %v528_v10 = vld [vmem:[#allocation2 + $0xc8] sm:$0xff]   ;;  %v532_v14 = vld [vmem:[#allocation2 + $0xd0] sm:$0xff]   ;;  %v102_v38 = vand.u32 127, %v101_v37  ;;  %v610_v41 = vmov 1.0|1.0  }
  0x16   :  { %465 = vmatprep.subr.bf16.mxu0 %v523_v3  ;;  %487 = vmatprep.subr.bf16.mxu1 %v524_v4  ;;  %v526_v6 = vld [vmem:[#allocation2 + $0x80] sm:$0xff]   ;;  %v529_v11 = vld [vmem:[#allocation2 + $0x8] sm:$0xff]   ;;  %v533_v15 = vld [vmem:[#allocation2 + $0x10] sm:$0xff]   ;;  %s411_s29 = sshll.u32 %s611_s28, 4  ;;  %s412_s29 = int_to_ptr.vmem [resolvable:$true] %s411_s29 }
  0x17   :  { %466 = vmatpush3.bf16.msra.mxu0 %v525_v5  ;;  %488 = vmatpush3.bf16.msra.mxu1 %v526_v6  ;;  %v530_v12 = vld [vmem:[#allocation2 + $0x88] sm:$0xff]   ;;  %v534_v16 = vld [vmem:[#allocation2 + $0x90] sm:$0xff]   ;;  %v535_v17 = vld [vmem:[#allocation2 + $0x58] sm:$0xff]   ;;  %s577_s30 = scalar_lea.vmem %s412_s29, 128  ;;  %p582_p9 = scmp.lt.s32.totalorder %s412_s29, %s412_s29 }
  0x18   :  { %467 = vmatprep.subr.bf16.mxu0 %v527_v9  ;;  %489 = vmatprep.subr.bf16.mxu1 %v528_v10  ;;  %v536_v18 = vld [vmem:[#allocation2 + $0xd8] sm:$0xff]   ;;  %v539_v21 = vld [vmem:[#allocation2 + $0x60] sm:$0xff]   ;;  %v543_v25 = vld [vmem:[#allocation2 + $0x68] sm:$0xff]   ;;  %p578_p8 = scmp.ne.s32.totalorder %s412_s29, %s577_s30  ;;  %p583_p10 = scmp.lt.s32.totalorder %s577_s30, %s577_s30 }
  0x19   :  { %521 = vset.pattern.permute.xlu1 %v608_v7  ;;  %519 = vset.pattern.permute.xlu0 %v609_v8  ;;  %v537_v19 = vld [vmem:[#allocation2 + $0x18] sm:$0xff]   ;;  %v540_v22 = vld [vmem:[#allocation2 + $0xe0] sm:$0xff]   ;;  %v544_v26 = vld [vmem:[#allocation2 + $0xe8] sm:$0xff]  }
  0x1a   :  { %119 = vperm.xlu1 %521, %v103_v2   ;;  %105 = vperm.xlu0 %519, %v103_v2   ;;  %v538_v20 = vld [vmem:[#allocation2 + $0x98] sm:$0xff]   ;;  %v541_v23 = vld [vmem:[#allocation2 + $0x20] sm:$0xff]   ;;  %v545_v27 = vld [vmem:[#allocation2 + $0x28] sm:$0xff]   ;;  %p584_p11 = por %p583_p10, %p582_p9 }
  0x1b   :  { %468 = vmatpush3.bf16.msra.mxu0 %v529_v11  ;;  %490 = vmatpush3.bf16.msra.mxu1 %v530_v12  ;;  %v542_v24 = vld [vmem:[#allocation2 + $0xa0] sm:$0xff]   ;;  %v546_v28 = vld [vmem:[#allocation2 + $0xa8] sm:$0xff]   ;;  %v547_v29 = vld [vmem:[#allocation2 + $0x70] sm:$0xff]  }
  0x1c   :  { %469 = vmatprep.subr.bf16.mxu0 %v531_v13  ;;  %491 = vmatprep.subr.bf16.mxu1 %v532_v14  ;;  %v548_v30 = vld [vmem:[#allocation2 + $0xf0] sm:$0xff]   ;;  %v551_v33 = vld [vmem:[#allocation2 + $0x78] sm:$0xff]   ;;  %p585_p12 = pnand %p584_p11, %p578_p8 }
  0x1d   :  { %v549_v31 = vld [vmem:[#allocation2 + $0x30] sm:$0xff]   ;;  %v552_v34 = vld [vmem:[#allocation2 + $0xf8] sm:$0xff]  }
  0x1e   :  { %522 = vset.pattern.permute.xlu0 %v606_v0  ;;  %v550_v32 = vld [vmem:[#allocation2 + $0xb0] sm:$0xff]   ;;  %v553_v35 = vld [vmem:[#allocation2 + $0x38] sm:$0xff]  }
  0x1f   :  { %470 = vmatpush3.bf16.msra.mxu0 %v533_v15  ;;  %492 = vmatpush3.bf16.msra.mxu1 %v534_v16  ;;  %v554_v36 = vld [vmem:[#allocation2 + $0xb8] sm:$0xff]  }
  0x20   :  { %471 = vmatprep.subr.bf16.mxu0 %v535_v17  ;;  %493 = vmatprep.subr.bf16.mxu1 %v536_v18  ;;  %v420_v47 = vld [vmem:[%s664_s2] ss:$0 sm:$0xff] }
  0x23   :  { %472 = vmatpush3.bf16.msra.mxu0 %v537_v19  ;;  %494 = vmatpush3.bf16.msra.mxu1 %v538_v20 }
  0x24   :  { %473 = vmatprep.subr.bf16.mxu0 %v539_v21  ;;  %495 = vmatprep.subr.bf16.mxu1 %v540_v22 }
  0x27   :  { %474 = vmatpush3.bf16.msra.mxu0 %v541_v23  ;;  %496 = vmatpush3.bf16.msra.mxu1 %v542_v24 }
  0x28   :  { %475 = vmatprep.subr.bf16.mxu0 %v543_v25  ;;  %497 = vmatprep.subr.bf16.mxu1 %v544_v26 }
  0x2b   :  { %476 = vmatpush3.bf16.msra.mxu0 %v545_v27  ;;  %498 = vmatpush3.bf16.msra.mxu1 %v546_v28 }
  0x2c   :  { %477 = vmatprep.subr.bf16.mxu0 %v547_v29  ;;  %499 = vmatprep.subr.bf16.mxu1 %v548_v30 }
  0x2f   :  { %478 = vmatpush3.bf16.msra.mxu0 %v549_v31  ;;  %500 = vmatpush3.bf16.msra.mxu1 %v550_v32 }
  0x30   :  { %479 = vmatprep.subr.bf16.mxu0 %v551_v33  ;;  %501 = vmatprep.subr.bf16.mxu1 %v552_v34 }
  0x33   :  { %480 = vmatpush3.bf16.msra.mxu0 %v553_v35  ;;  %502 = vmatpush3.bf16.msra.mxu1 %v554_v36 }
  0x94   :  { %v113_v39 = vpop.permute.xlu0 %112  ;;  %v127_v40 = vpop.permute.xlu1 %126 }
  0x95   :  { %vm114_vm0 = vcmp.eq.s32.totalorder %v102_v38, %v113_v39  ;;  %vm128_vm1 = vcmp.eq.s32.totalorder %v102_v38, %v127_v40 }
  0x96   :  { %vm457_vm2 = vmpackc.low %vm114_vm0, %vm114_vm0 }
  0x97   :  { %458 = vmatprep.mubr.msk.bf16.mxu0 %vm457_vm2, %v610_v41  ;;  %vm461_vm3 = vmpackc.low %vm128_vm1, %vm128_vm1 }
  0x98   :  { %462 = vmatprep.mubr.msk.bf16.mxu1 %vm461_vm3, %v610_v41 }
  0x99   :  { %v120_v42 = vpop.permute.xlu1 %119  ;;  %v106_v43 = vpop.permute.xlu0 %105 }
  0x9a   :  { %vm121_vm4 = vcmp.eq.s32.totalorder %v102_v38, %v120_v42  ;;  %vm107_vm5 = vcmp.eq.s32.totalorder %v102_v38, %v106_v43 }
  0x9b   :  { %vm463_vm6 = vmpackc.low %vm121_vm4, %vm121_vm4 }
  0x9c   :  { %vm459_vm7 = vmpackc.low %vm107_vm5, %vm107_vm5  ;;  %464 = vmatmul.mubr.msk.bf16.vlgmr.msra.gmra.mrb[0].mxu1 %vm463_vm6, %v610_v41 }
  0x9d   :  { %460 = vmatmul.mubr.msk.bf16.vlgmr.msra.gmra.mrb[0].mxu0 %vm459_vm7, %v610_v41 }
 0x16f   :  { %v503_v44 = vpop.f32.mrb[0].mxu1 }
 0x170   :  { %v481_v45 = vpop.f32.mrb[0].mxu0  ;;  %v504_v46 = vpop.f32.mrb[1].mxu1 }
 0x171   :  { %v482_v48 = vpop.f32.mrb[1].mxu0  ;;  %v505_v49 = vadd.f32 %v504_v46, %v503_v44  ;;  %v506_v50 = vpop.f32.mrb[2].mxu1 }
 0x172   :  { %v483_v51 = vadd.f32 %v482_v48, %v481_v45  ;;  %v484_v52 = vpop.f32.mrb[2].mxu0  ;;  %v507_v53 = vpop.f32.mrb[3].mxu1 }
 0x173   :  { %v485_v54 = vpop.f32.mrb[3].mxu0 }
 0x174   :  { %v359_v55 = vadd.f32 %v483_v51, %v420_v47 }
 0x176   :  { %v399_v56 = vadd.f32 %v505_v49, %v359_v55 }
 0x178   :  { %404 = vst [vmem:[#allocation5] sm:$0xff] %v399_v56 }
 0x179   :  { %588 = shalt.err (!%p585_p12)
}
 0x17a   :  { %s589_s5 = scalar_lea.hbm %s665_s3, 128 }
 0x17b   :  { %p590_p13 = scmp.ne.s32.totalorder %s665_s3, %s589_s5  ;;  %p593_p0 = scmp.lt.u32.totalorder %s589_s5, %s665_s3 }
 0x17d   :  { %p595_p1 = pnand %p593_p0, %p590_p13 }
 0x17f   :  { %598 = shalt.err (!%p595_p1)
}
 0x180   :  { %414 = dma.vmem_to_hbm [thread:$0]  %s412_s29, 128, %s665_s3, [#allocation4]  }
 0x181   :  { %601 = dma.done.wait [#allocation4], 128  }
 0x182   :  { %602 = vsyncadd [#allocation4], 4294967168 }
 0x183   :  { %418 = vsyncpa [#allocation3], 1 }
 0x184   :  { %419 = vsyncpa [#allocation4], 1 }

</bundles_post_ra>
